<compile_context>
chip_gen: v5e
topology: v5e:2x2
jax: 0.10.0
libtpu: 0.0.40
codegen_flags: <defaults>
</compile_context>

<pallas_src>
import jax
import jax.numpy as jnp
import numpy as np
from jax.experimental import pallas as pl
from jax.experimental.pallas import tpu as pltpu


def _pick_tiles(C, L, budget_bytes=8 * 1024 * 1024):
    """Largest (tC, tL) f32 block such that the two double-buffered input
    streams (res, mask) stay within ~budget_bytes of VMEM (safe with the
    default scoped limits on v5e/v6e/v7x).  Returned tiles always divide the
    (possibly C-padded) array dims exactly, so no ragged edge blocks."""
    max_elems = budget_bytes // (2 * 2 * 4)          # tC * tL elements
    if C * L <= max_elems:
        return C, L                                   # whole per-sample slab
    if L % 128 == 0:
        # Keep the whole C reduction per step, tile the lane axis.
        for cand in (4096, 2048, 1024, 512, 256, 128):
            if L % cand == 0 and C * cand <= max_elems:
                return C, cand
        # Even a 128-lane stripe of all classes is too big: tile C as well.
        tC = max(8, min(C, ((max_elems // 128) // 8) * 8))
        return tC, 128
    # L has no 128-divisible tiling: keep lanes whole, tile the C reduction.
    tC = max(8, min(C, ((max_elems // L) // 8) * 8))
    return tC, L


def _masked_mse_partial_kernel(res_ref, gt_ref, mask_ref, num_ref, den_ref):
    # res_ref / mask_ref: (1, tC, tL) f32 ;  gt_ref: (1, 1, tL) int32
    # num_ref / den_ref:  (1, 1, tL)  f32 accumulators, resident across the
    # C-reduction grid axis (same output block index for every c step).
    c_blk = pl.program_id(2)
    tC = res_ref.shape[1]

    @pl.when(c_blk == 0)
    def _():
        num_ref[...] = jnp.zeros_like(num_ref)
        den_ref[...] = jnp.zeros_like(den_ref)

    res = res_ref[...]
    mask = mask_ref[...]
    gt = gt_ref[...]

    # Absolute class id of each row of this C tile -- no full one-hot tensor,
    # no cast, no extra subtract: a single select does (res - onehot).
    cls = c_blk * tC + jax.lax.broadcasted_iota(jnp.int32, (1, tC, 1), 1)
    diff = jnp.where(gt == cls, res - 1.0, res)
    loss = diff * diff * mask

    num_ref[...] += jnp.sum(loss, axis=1, keepdims=True)
    den_ref[...] += jnp.sum(mask, axis=1, keepdims=True)


def masked_mse_loss(res, gt, mask):
    """res, mask: (N, C, H, W) f32; gt: (N, H, W) int -> scalar f32."""
    N, C, H, W = res.shape
    L = H * W

    res3 = res.reshape(N, C, L)
    mask3 = mask.reshape(N, C, L)
    gt3 = gt.astype(jnp.int32).reshape(N, 1, L)

    tC, tL = _pick_tiles(C, L)

    # If C has to be tiled, zero-pad the class axis to a multiple of tC.
    # Padded classes never match gt (gt < C) and have mask == 0, so they
    # contribute exactly 0 to both num and den.
    C_pad = -(-C // tC) * tC
    if C_pad != C:
        pad = ((0, 0), (0, C_pad - C), (0, 0))
        res3 = jnp.pad(res3, pad)
        mask3 = jnp.pad(mask3, pad)

    grid = (N, L // tL, C_pad // tC)

    num, den = pl.pallas_call(
        _masked_mse_partial_kernel,
        out_shape=(jax.ShapeDtypeStruct((N, 1, L), jnp.float32),
                   jax.ShapeDtypeStruct((N, 1, L), jnp.float32)),
        grid_spec=pltpu.PrefetchScalarGridSpec(
            num_scalar_prefetch=0,
            grid=grid,
            in_specs=[
                pl.BlockSpec((1, tC, tL), lambda n, l, c: (n, c, l)),  # res
                pl.BlockSpec((1, 1, tL), lambda n, l, c: (n, 0, l)),   # gt
                pl.BlockSpec((1, tC, tL), lambda n, l, c: (n, c, l)),  # mask
            ],
            out_specs=[
                pl.BlockSpec((1, 1, tL), lambda n, l, c: (n, 0, l)),   # num
                pl.BlockSpec((1, 1, tL), lambda n, l, c: (n, 0, l)),   # den
            ],
        ),
        compiler_params=pltpu.CompilerParams(
            dimension_semantics=("parallel", "parallel", "arbitrary"),
            vmem_limit_bytes=32 * 1024 * 1024,
        ),
    )(res3, gt3, mask3)

    # Tiny JAX glue (1/C of the kernel's traffic): finish the H reduction,
    # per-(n, w) divide, scalar mean.  den == 0 -> Inf/NaN, matching PyTorch.
    num_w = num.reshape(N, H, W).sum(axis=1)   # (N, W)
    den_w = den.reshape(N, H, W).sum(axis=1)   # (N, W)
    return jnp.mean(num_w / den_w)


def _reference(res, gt, mask, classes):
    onehot = jax.nn.one_hot(gt, classes, dtype=jnp.float32)   # (N,H,W,C)
    onehot = jnp.transpose(onehot, (0, 3, 1, 2))              # (N,C,H,W)
    loss = (res - onehot) ** 2 * mask
    sample = loss.sum(axis=(1, 2)) / mask.sum(axis=(1, 2))    # (N, W)
    return jnp.mean(sample)


if __name__ == "__main__":
    classes = 10
    N, H, W = 2, 16, 16
    key = jax.random.PRNGKey(0)
    k1, k2, k3 = jax.random.split(key, 3)

    res = jax.random.normal(k1, (N, classes, H, W), dtype=jnp.float32)
    gt = jax.random.randint(k2, (N, H, W), 0, classes, dtype=jnp.int32)
    # binary mask; with C*H = 160 elements per (n, w) column the denominator
    # is always > 0 in practice for this seed
    mask = jax.random.bernoulli(k3, 0.5, (N, classes, H, W)).astype(jnp.float32)

    out = jax.block_until_ready(masked_mse_loss(res, gt, mask))

    ref = _reference(res, gt, mask, classes)
    np.testing.assert_allclose(np.asarray(out), np.asarray(ref),
                               rtol=1e-5, atol=1e-5)
    print("KERNEL_OK")
</pallas_src>

<mosaic_0001>
module attributes {stable_mosaic.version = 11 : i64} {
  func.func @_masked_mse_partial_kernel(%arg0: i32, %arg1: i32, %arg2: i32, %arg3: memref<1x10x256xf32, #tpu.memory_space<vmem>>, %arg4: memref<1x1x256xi32, #tpu.memory_space<vmem>>, %arg5: memref<1x10x256xf32, #tpu.memory_space<vmem>>, %arg6: memref<1x1x256xf32, #tpu.memory_space<vmem>>, %arg7: memref<1x1x256xf32, #tpu.memory_space<vmem>>) attributes {dimension_semantics = [#tpu.dimension_semantics<parallel>, #tpu.dimension_semantics<parallel>, #tpu.dimension_semantics<arbitrary>], iteration_bounds = array<i64: 2, 1, 1>, scalar_prefetch = 0 : i64, scratch_operands = 0 : i64, tpu.core_type = #tpu.core_type<tc>, window_params = [{transform_indices = @transform_0, window_bounds = array<i64: 1, 10, 256>}, {transform_indices = @transform_1, window_bounds = array<i64: 1, 1, 256>}, {transform_indices = @transform_2, window_bounds = array<i64: 1, 10, 256>}, {transform_indices = @transform_3, window_bounds = array<i64: 1, 1, 256>}, {transform_indices = @transform_4, window_bounds = array<i64: 1, 1, 256>}]} {
    %c0_i32 = arith.constant 0 : i32
    %0 = arith.cmpi eq, %arg2, %c0_i32 : i32
    %1 = arith.extui %0 : i1 to i32
    %c0_i32_0 = arith.constant 0 : i32
    %2 = arith.cmpi ne, %1, %c0_i32_0 : i32
    scf.if %2 {
      %cst_23 = arith.constant 0.000000e+00 : f32
      %28 = vector.broadcast %cst_23 : f32 to vector<1x1x256xf32>
      %c0_24 = arith.constant 0 : index
      %c0_25 = arith.constant 0 : index
      %c0_26 = arith.constant 0 : index
      %29 = vector.load %arg6[%c0_24, %c0_25, %c0_26] : memref<1x1x256xf32, #tpu.memory_space<vmem>>, vector<1x1x256xf32>
      tpu.vector_store %arg6[%c0_24, %c0_25, %c0_26], %28 {strides = array<i32>} : memref<1x1x256xf32, #tpu.memory_space<vmem>>, vector<1x1x256xf32>,
      %cst_27 = arith.constant 0.000000e+00 : f32
      %30 = vector.broadcast %cst_27 : f32 to vector<1x1x256xf32>
      %c0_28 = arith.constant 0 : index
      %c0_29 = arith.constant 0 : index
      %c0_30 = arith.constant 0 : index
      %31 = vector.load %arg7[%c0_28, %c0_29, %c0_30] : memref<1x1x256xf32, #tpu.memory_space<vmem>>, vector<1x1x256xf32>
      tpu.vector_store %arg7[%c0_28, %c0_29, %c0_30], %30 {strides = array<i32>} : memref<1x1x256xf32, #tpu.memory_space<vmem>>, vector<1x1x256xf32>,
    } else {
    }
    %c0 = arith.constant 0 : index
    %c0_1 = arith.constant 0 : index
    %c0_2 = arith.constant 0 : index
    %3 = vector.load %arg3[%c0, %c0_1, %c0_2] : memref<1x10x256xf32, #tpu.memory_space<vmem>>, vector<1x10x256xf32>
    %c0_3 = arith.constant 0 : index
    %c0_4 = arith.constant 0 : index
    %c0_5 = arith.constant 0 : index
    %4 = vector.load %arg5[%c0_3, %c0_4, %c0_5] : memref<1x10x256xf32, #tpu.memory_space<vmem>>, vector<1x10x256xf32>
    %c0_6 = arith.constant 0 : index
    %c0_7 = arith.constant 0 : index
    %c0_8 = arith.constant 0 : index
    %5 = vector.load %arg4[%c0_6, %c0_7, %c0_8] : memref<1x1x256xi32, #tpu.memory_space<vmem>>, vector<1x1x256xi32>
    %c10_i32 = arith.constant 10 : i32
    %6 = arith.muli %arg2, %c10_i32 : i32
    %7 = tpu.iota {dimensions = array<i32: 1>} : vector<1x10x1xi32>
    %8 = vector.broadcast %6 : i32 to vector<1x10x1xi32>
    %9 = arith.addi %8, %7 : vector<1x10x1xi32>
    %10 = vector.broadcast %5 : vector<1x1x256xi32> to vector<1x10x256xi32>
    %11 = vector.broadcast %9 : vector<1x10x1xi32> to vector<1x10x256xi32>
    %12 = arith.cmpi eq, %10, %11 : vector<1x10x256xi32>
    %cst = arith.constant 1.000000e+00 : f32
    %13 = vector.broadcast %cst : f32 to vector<1x10x256xf32>
    %14 = arith.subf %3, %13 : vector<1x10x256xf32>
    %15 = arith.select %12, %14, %3 : vector<1x10x256xi1>, vector<1x10x256xf32>
    %16 = arith.mulf %15, %15 : vector<1x10x256xf32>
    %17 = arith.mulf %16, %4 : vector<1x10x256xf32>
    %c0_9 = arith.constant 0 : index
    %c0_10 = arith.constant 0 : index
    %c0_11 = arith.constant 0 : index
    %18 = vector.load %arg6[%c0_9, %c0_10, %c0_11] : memref<1x1x256xf32, #tpu.memory_space<vmem>>, vector<1x1x256xf32>
    %cst_12 = arith.constant dense<0.000000e+00> : vector<1x256xf32>
    %19 = vector.multi_reduction <add>, %17, %cst_12 [1] : vector<1x10x256xf32> to vector<1x256xf32>
    %20 = vector.shape_cast %19 : vector<1x256xf32> to vector<1x1x256xf32>
    %21 = arith.addf %18, %20 : vector<1x1x256xf32>
    %c0_13 = arith.constant 0 : index
    %c0_14 = arith.constant 0 : index
    %c0_15 = arith.constant 0 : index
    %22 = vector.load %arg6[%c0_13, %c0_14, %c0_15] : memref<1x1x256xf32, #tpu.memory_space<vmem>>, vector<1x1x256xf32>
    tpu.vector_store %arg6[%c0_13, %c0_14, %c0_15], %21 {strides = array<i32>} : memref<1x1x256xf32, #tpu.memory_space<vmem>>, vector<1x1x256xf32>,
    %c0_16 = arith.constant 0 : index
    %c0_17 = arith.constant 0 : index
    %c0_18 = arith.constant 0 : index
    %23 = vector.load %arg7[%c0_16, %c0_17, %c0_18] : memref<1x1x256xf32, #tpu.memory_space<vmem>>, vector<1x1x256xf32>
    %cst_19 = arith.constant dense<0.000000e+00> : vector<1x256xf32>
    %24 = vector.multi_reduction <add>, %4, %cst_19 [1] : vector<1x10x256xf32> to vector<1x256xf32>
    %25 = vector.shape_cast %24 : vector<1x256xf32> to vector<1x1x256xf32>
    %26 = arith.addf %23, %25 : vector<1x1x256xf32>
    %c0_20 = arith.constant 0 : index
    %c0_21 = arith.constant 0 : index
    %c0_22 = arith.constant 0 : index
    %27 = vector.load %arg7[%c0_20, %c0_21, %c0_22] : memref<1x1x256xf32, #tpu.memory_space<vmem>>, vector<1x1x256xf32>
    tpu.vector_store %arg7[%c0_20, %c0_21, %c0_22], %26 {strides = array<i32>} : memref<1x1x256xf32, #tpu.memory_space<vmem>>, vector<1x1x256xf32>,
    return
  }
  func.func @transform_0(%arg0: i32, %arg1: i32, %arg2: i32) -> (i32, i32, i32) {
    %c0_i32 = arith.constant 0 : i32
    return %arg0, %arg2, %arg1 : i32, i32, i32
  }
  func.func @transform_1(%arg0: i32, %arg1: i32, %arg2: i32) -> (i32, i32, i32) {
    %c0_i32 = arith.constant 0 : i32
    %c0_i32_0 = arith.constant 0 : i32
    return %arg0, %c0_i32, %arg1 : i32, i32, i32
  }
  func.func @transform_2(%arg0: i32, %arg1: i32, %arg2: i32) -> (i32, i32, i32) {
    %c0_i32 = arith.constant 0 : i32
    return %arg0, %arg2, %arg1 : i32, i32, i32
  }
  func.func @transform_3(%arg0: i32, %arg1: i32, %arg2: i32) -> (i32, i32, i32) {
    %c0_i32 = arith.constant 0 : i32
    %c0_i32_0 = arith.constant 0 : i32
    return %arg0, %c0_i32, %arg1 : i32, i32, i32
  }
  func.func @transform_4(%arg0: i32, %arg1: i32, %arg2: i32) -> (i32, i32, i32) {
    %c0_i32 = arith.constant 0 : i32
    %c0_i32_0 = arith.constant 0 : i32
    return %arg0, %c0_i32, %arg1 : i32, i32, i32
  }
}

</mosaic_0001>

<bundles_post_ra>
// kernel: tpu_custom_call.1
= control target key start
LH: loop header
LB: loop body
LE: loop exit
PB: predicated region body
PF: predicated region fallthrough
CT: control target
= control target key end

     0   :  { %10 = vsyncpa [#allocation3], 0  ;;  %s1031_s0 = inlined_call_operand.vmem [shape: f32[2,10,256], index: 0, kind: input, shape index: {}]   ;;  %s1032_s1 = inlined_call_operand.vmem [shape: s32[2,1,256], index: 1, kind: input, shape index: {}]   ;;  %s1033_s2 = inlined_call_operand.vmem [shape: f32[2,10,256], index: 2, kind: input, shape index: {}]   ;;  %s1034_s3 = inlined_call_operand.hbm [shape: f32[2,1,256], index: 3, kind: output, shape index: {0}]   ;;  %s1035_s4 = inlined_call_operand.hbm [shape: f32[2,1,256], index: 4, kind: output, shape index: {1}]  }
   0x1   :  { %12 = vsyncpa [#allocation3 + $0x1], 0 }
   0x2   :  { %13 = vsyncpa [#allocation5], 0 }
   0x3   :  { %15 = vsyncpa [#allocation5 + $0x1], 0  ;;  %s877_s15 = smov 0   ;;  %s879_s16 = smov 0  }
   0x4   :  { %s881_s17 = smov 0   ;;  %s883_s18 = smov 0  }
   0x5   :  { %s885_s19 = smov 0   ;;  %s887_s20 = smov 0  }
   0x6 LB: > { %s654_s21 = sadd.s32 4294967295, %s849_s20   ;;  %s655_s22 = sadd.s32 4294967294, %s849_s20   ;;  %s849_s20 = sphi %s887_s20, %s21_s20   ;;  %s845_s19 = sphi %s885_s19, %s1044_s19   ;;  %s841_s18 = sphi %s883_s18, %s1043_s18   ;;  %s837_s17 = sphi %s881_s17, %s1042_s17   ;;  %s833_s16 = sphi %s879_s16, %s1041_s16   ;;  %s829_s15 = sphi %s877_s15, %s1040_s15  }
   0x7   : > { %s40_s23 = sadd.s32 1, %s845_s19  ;;  %s137_s24 = sadd.s32 1, %s837_s17 }
   0x8   : > { %p42_p0 = scmp.ge.s32.totalorder %s40_s23, 2  ;;  %p147_p1 = scmp.ne.s32.totalorder %s837_s17, %s833_s16 }
   0x9   : > { %p148_p2 = scmp.eq.s32.totalorder %s654_s21, 1  ;;  %p153_p3 = scmp.ne.s32.totalorder %s833_s16, %s829_s15 }
   0xa   : > { %s1046_s23 = smov (%p42_p0, %s40_s23), 0  ;;  %p154_p5 = scmp.eq.s32.totalorder %s655_s22, 1 }
   0xb   : > { %p917_p4 = por %p148_p2, %p147_p1  ;;  %s132_s26 = ssub.s32 %s845_s19, %s1046_s23 }
   0xc   : > { %p658_p6 = scmp.ge.s32.totalorder %s849_s20, 1  ;;  %p135_p7 = scmp.eq.s32.totalorder %s132_s26, 0 }
   0xd   : > { %p924_p8 = por %p154_p5, %p153_p3  ;;  %p250_p9 = scmp.lt.s32.totalorder %s849_s20, 3 }
   0xe   : > { %s930_s28 = scalar_select %p135_p7, %s837_s17, %s137_s24  }
   0xf   : > { %p251_p10 = pnand %p658_p6, %p250_p9 }
  0x10   : > { %s933_s29 = sand.u32 (!%p251_p10), 1, %s833_s16   ;;  %p314_p11 = scmp.lt.s32.totalorder (!%p251_p10), %s841_s18, 1 }
  0x11   : > { %254 = sbr.rel (%p251_p10) target bundleno = 69 (0x45), region = 32  ;;  %s659_s30 = sshll.u32 (!%p251_p10), %s933_s29, 1 }
  0x12   : > { %s942_s6 = scalar_lea.vmem (!%p251_p10), [#allocation2], %s659_s30  ;;  %s947_s7 = scalar_lea.vmem (!%p251_p10), [#allocation4], %s659_s30 }
  0x13   : > { %s672_s30 = sshll.u32 (!%p251_p10), %s841_s18, 1  ;;  %s477_s14 = sshll.u32 (!%p251_p10), %s942_s6, 4  ;;  %s478_s14 = int_to_ptr.vmem [resolvable:$true] %s477_s14 }
  0x14   : > { %s974_s13 = scalar_lea.hbm (!%p251_p10), %s1034_s3, %s672_s30  ;;  %s463_s22 = scalar_lea.sflag (!%p251_p10), [#allocation5], %s933_s29 }
  0x16   : > { %v359_v0 = vlaneseq  ;;  %s315_s5 = scalar_select %p314_p11, %s841_s18, 1  ;;  %v851_v2 = vmov 0.0   ;;  %vm404_vm1 = vcmask 1041408   ;;  %vm424_vm6 = vcmask 1040384  }
  0x17   : > { %s493_s18 = sshll.u32 %s947_s7, 4  ;;  %s494_s18 = int_to_ptr.vmem [resolvable:$true] %s493_s18 }
  0x18   : > { %vm937_vm0 = vcmp.lt.s32.totalorder %v359_v0, 256  ;;  %v376_v3 = vshrl.u32 %v359_v0, 7  ;;  %s676_s8 = sshll.u32 %s315_s5, 5  ;;  %s663_s9 = sshll.u32 %s315_s5, 1 }
  0x19   : > { %363 = vst.msk [vmem:[%s942_s6] sm:$0x3] %vm937_vm0, %v851_v2  ;;  %s325_s12 = scalar_lea.vmem %s1031_s0, %s676_s8  ;;  %s335_s21 = scalar_lea.vmem %s1032_s1, %s663_s9 }
  0x1a   : > { %364 = vst.msk [vmem:[%s947_s7] sm:$0x3] %vm937_vm0, %v851_v2  ;;  %s350_s26 = scalar_lea.vmem %s1033_s2, %s676_s8  ;;  %v365_v4 = vld [vmem:[%s325_s12] sm:$0xff]  ;;  %v366_v5 = vld [vmem:[%s325_s12 + $0x8] sm:$0xff]  ;;  %v367_v6 = vld [vmem:[%s325_s12 + $0x10] sm:$0x3]  ;;  %s491_s9 = scalar_lea.hbm %s1035_s4, %s672_s30 }
  0x1b   : > { %v368_v7 = vld [vmem:[%s325_s12 + $0x18] sm:$0x3]  ;;  %v377_v8 = vadd.s32 8, %v376_v3  ;;  %v371_v9 = vld [vmem:[%s350_s26 + $0x10] sm:$0x3]  ;;  %v666_v11 = vadd.f32 -1.0, %v365_v4 }
  0x1c   : > { %v373_v10 = vld [vmem:[%s335_s21] sm:$0x3]  ;;  %v667_v12 = vadd.f32 -1.0, %v366_v5  ;;  %v372_v13 = vld [vmem:[%s350_s26 + $0x18] sm:$0x3]  ;;  %v668_v16 = vadd.f32 -1.0, %v367_v6 }
  0x1d   : > { %v381_v14 = vperm.slane %v373_v10, 0  ;;  %v382_v15 = vperm.slane %v373_v10, 1  ;;  %v669_v17 = vadd.f32 -1.0, %v368_v7  ;;  %v442_v18 = vsel %vm404_vm1, %v372_v13, 0.0  ;;  %v369_v20 = vld [vmem:[%s350_s26] sm:$0xff]  ;;  %v370_v21 = vld [vmem:[%s350_s26 + $0x8] sm:$0xff] }
  0x1e   : > { %v434_v19 = vsel %vm404_vm1, %v371_v9, 0.0  ;;  %v443_v30 = vadd.f32 %v442_v18, %v370_v21  ;;  %s495_s10 = sshll.u32 %s491_s9, 4  ;;  %s479_s21 = sshll.u32 %s974_s13, 4  ;;  %s496_s10 = int_to_ptr.hbm [resolvable:$true] %s495_s10  ;;  %s480_s21 = int_to_ptr.hbm [resolvable:$true] %s479_s21 }
  0x1f   : > { %vm383_vm2 = vcmp.eq.s32.totalorder %v381_v14, %v376_v3  ;;  %vm384_vm3 = vcmp.eq.s32.totalorder %v382_v15, %v376_v3  ;;  %vm385_vm4 = vcmp.eq.s32.totalorder %v381_v14, %v377_v8  ;;  %vm386_vm5 = vcmp.eq.s32.totalorder %v382_v15, %v377_v8  ;;  %s753_s24 = sshra.s32 %s496_s10, 4  ;;  %s759_s8 = scalar_lea.hbm %s1035_s4, 4  ;;  %s754_s24 = int_to_ptr.hbm [resolvable:$true] %s753_s24 }
  0x20   : > { %v391_v22 = vsel %vm383_vm2, %v666_v11, %v365_v4  ;;  %v392_v23 = vsel %vm384_vm3, %v667_v12, %v366_v5  ;;  %v393_v24 = vsel %vm385_vm4, %v668_v16, %v367_v6  ;;  %v394_v25 = vsel %vm386_vm5, %v669_v17, %v368_v7  ;;  %v403_v5 = vld [vmem:[%s942_s6] sm:$0x3]  ;;  %s755_s26 = scalar_lea.hbm %s754_s24, 2  ;;  %p760_p1 = scmp.lt.s32.totalorder %s754_s24, %s1035_s4 }
  0x21   : > { %v395_v26 = vmul.f32 %v391_v22, %v391_v22  ;;  %v396_v27 = vmul.f32 %v392_v23, %v392_v23  ;;  %v397_v28 = vmul.f32 %v393_v24, %v393_v24  ;;  %v398_v29 = vmul.f32 %v394_v25, %v394_v25  ;;  %v433_v60 = vld [vmem:[%s947_s7] sm:$0x3]  ;;  %p756_p12 = scmp.ne.s32.totalorder %s754_s24, %s755_s26  ;;  %p761_p2 = scmp.lt.s32.totalorder %s759_s8, %s755_s26 }
  0x22   : > { %v435_v31 = vadd.f32 %v434_v19, %v369_v20  ;;  %v444_v37 = vrot.slane %v443_v30, 4 }
  0x23   : > { %v399_v32 = vmul.f32 %v395_v26, %v369_v20  ;;  %v400_v33 = vmul.f32 %v396_v27, %v370_v21  ;;  %v401_v34 = vmul.f32 %v397_v28, %v371_v9  ;;  %v402_v35 = vmul.f32 %v398_v29, %v372_v13  ;;  %p757_p13 = pnand %p756_p12, %p917_p4  ;;  %p762_p3 = por %p761_p2, %p760_p1 }
  0x24   : > { %v436_v36 = vrot.slane %v435_v31, 4  ;;  %v445_v43 = vadd.f32 %v444_v37, %v443_v30 }
  0x25   : > { %v413_v38 = vsel %vm404_vm1, %v402_v35, 0.0  ;;  %v405_v39 = vsel %vm404_vm1, %v401_v34, 0.0  ;;  %p758_p0 = pneg %p757_p13 }
  0x26   : > { %v414_v40 = vadd.f32 %v413_v38, %v400_v33  ;;  %v406_v41 = vadd.f32 %v405_v39, %v399_v32  ;;  %v437_v42 = vadd.f32 %v436_v36, %v435_v31  ;;  %v446_v47 = vrot.slane %v445_v43, 2 }
  0x27   : > { %p763_p5 = pnand %p762_p3, %p758_p0 }
  0x28   : > { %v407_v44 = vrot.slane %v406_v41, 4  ;;  %v415_v45 = vrot.slane %v414_v40, 4  ;;  %v438_v46 = vrot.slane %v437_v42, 2  ;;  %v447_v51 = vadd.f32 %v446_v47, %v445_v43 }
  0x2a   : > { %v408_v48 = vadd.f32 %v407_v44, %v406_v41  ;;  %v416_v49 = vadd.f32 %v415_v45, %v414_v40  ;;  %v439_v50 = vadd.f32 %v438_v46, %v437_v42  ;;  %v448_v55 = vrot.slane %v447_v51, 1 }
  0x2c   : > { %v409_v52 = vrot.slane %v408_v48, 2  ;;  %v417_v53 = vrot.slane %v416_v49, 2  ;;  %v440_v54 = vrot.slane %v439_v50, 1  ;;  %v449_v59 = vadd.f32 %v448_v55, %v447_v51 }
  0x2e   : > { %v410_v56 = vadd.f32 %v409_v52, %v408_v48  ;;  %v418_v57 = vadd.f32 %v417_v53, %v416_v49  ;;  %v441_v58 = vadd.f32 %v440_v54, %v439_v50  ;;  %v452_v63 = vrot.slane %v449_v59, 7 }
  0x30   : > { %v411_v61 = vrot.slane %v410_v56, 1  ;;  %v419_v62 = vrot.slane %v418_v57, 1  ;;  %v453_v3 = vsel %vm424_vm6, %v441_v58, %v452_v63 }
  0x31   : > { %v455_v4 = vadd.f32 %v453_v3, %v433_v60 }
  0x32   : > { %v412_v0 = vadd.f32 %v411_v61, %v410_v56  ;;  %v420_v2 = vadd.f32 %v419_v62, %v418_v57 }
  0x33   : > { %456 = vst.msk [vmem:[%s947_s7] sm:$0x3] %vm937_vm0, %v455_v4 }
  0x34   : > { %v423_v6 = vrot.slane %v420_v2, 7 }
  0x36   : > { %v425_v7 = vsel %vm424_vm6, %v412_v0, %v423_v6 }
  0x37   : > { %766 = shalt.err (!%p763_p5)
}
  0x38   : > { %679 = dma.vmem_to_hbm [thread:$0]  (%p917_p4), %s494_s18, 32, %s496_s10, %s463_s22   ;;  %v427_v8 = vadd.f32 %v425_v7, %v403_v5 }
  0x39   : > { %s458_s7 = scalar_lea.sflag [#allocation3], %s933_s29  ;;  %s781_s12 = sshra.s32 %s480_s21, 4  ;;  %s782_s12 = int_to_ptr.hbm [resolvable:$true] %s781_s12 }
  0x3a   : > { %432 = vst.msk [vmem:[%s942_s6] sm:$0x3] %vm937_vm0, %v427_v8  ;;  %s783_s13 = scalar_lea.hbm %s782_s12, 2  ;;  %s787_s30 = scalar_lea.hbm %s1034_s3, 4 }
  0x3b   : > { %p784_p6 = scmp.ne.s32.totalorder %s782_s12, %s783_s13  ;;  %p788_p10 = scmp.lt.s32.totalorder %s782_s12, %s1034_s3 }
  0x3c   : > { %p789_p11 = scmp.lt.s32.totalorder %s787_s30, %s783_s13 }
  0x3d   : > { %p785_p7 = pnand %p784_p6, %p917_p4 }
  0x3e   : > { %p790_p12 = por %p789_p11, %p788_p10 }
  0x3f   : > { %p786_p9 = pneg %p785_p7 }
  0x41   : > { %p791_p13 = pnand %p790_p12, %p786_p9 }
  0x43   : > { %794 = shalt.err (!%p791_p13)
}
  0x44   : > { %678 = dma.vmem_to_hbm [thread:$0]  (%p917_p4), %s478_s14, 32, %s480_s21, %s458_s7  }
  0x45 PF: > { %p689_p0 = scmp.ge.s32.totalorder %s849_s20, 2  ;;  %s507_s29 = sand.u32 1, %s829_s15  }
  0x46   : > { %s508_s6 = scalar_lea.sflag [#allocation3], %s507_s29 }
  0x47   : > { %p683_p1 = pnand %p689_p0, %p924_p8 }
  0x49   : > { %p684_p2 = pneg %p683_p1 }
  0x4b   : > { %820 = dma.done.wait (%p684_p2), %s508_s6, 32  }
  0x4c   : > { %822 = vsyncadd (%p684_p2), %s508_s6, 4294967264  ;;  %s518_s10 = scalar_lea.sflag [#allocation5], %s507_s29 }
  0x4d   : > { %824 = dma.done.wait (%p684_p2), %s518_s10, 32  }
  0x4e   : > { %826 = vsyncadd (%p684_p2), %s518_s10, 4294967264  ;;  %s21_s20 = sadd.s32 1, %s849_s20   ;;  %s1040_s15 = smov %s833_s16 }
  0x4f   : > { %p18_p3 = scmp.ge.s32.totalorder %s21_s20, 4   ;;  %s1041_s16 = smov %s837_s17 }
  0x50   : > { %s1042_s17 = smov %s930_s28  ;;  %s1043_s18 = smov %s845_s19 }
  0x51   : > { %s1044_s19 = smov %s1046_s23  ;;  %20 = sbr.rel (!%p18_p3) target bundleno = 6 (0x6), region = 94 }
  0x56   :  { %524 = vsyncpa [#allocation3], 1 }
  0x57   :  { %526 = vsyncpa [#allocation3 + $0x1], 1 }
  0x58   :  { %527 = vsyncpa [#allocation5], 1 }
  0x59   :  { %529 = vsyncpa [#allocation5 + $0x1], 1 }

</bundles_post_ra>
